<compile_context>
chip_gen: v7x
topology: tpu7x:2x2x1
jax: 0.10.0
libtpu: 0.0.40
codegen_flags: <defaults>
</compile_context>

<pallas_src>
import jax
import jax.numpy as jnp
from jax import lax
from jax.experimental import pallas as pl
from jax.experimental.pallas import tpu as pltpu

EPS = 1e-5


def _bn2d_kernel(x_ref, gamma_ref, beta_ref, o_ref):
    # x_ref:     (N, c_tile, HW) block in VMEM
    # gamma_ref: (c_tile, 1) float32
    # beta_ref:  (c_tile, 1) float32
    n, ct, hw = x_ref.shape
    inv_m = 1.0 / (n * hw)

    # ---- Fused single-sweep statistics -------------------------------------
    # Walk the lane (HW) axis in register-sized slabs (~16 vregs of f32) so a
    # single VMEM read per element feeds BOTH accumulators.
    target_elems = 16 * 1024                                    # ~64 KiB f32
    step = max(128, (target_elems // max(1, n * ct)) // 128 * 128)

    s = jnp.zeros((ct, 1), jnp.float32)
    sq = jnp.zeros((ct, 1), jnp.float32)
    for off in range(0, hw, step):                              # static unroll
        width = min(step, hw - off)
        xc = x_ref[:, :, off:off + width].astype(jnp.float32)   # (N, ct, width)
        s = s + jnp.sum(jnp.sum(xc, axis=-1, keepdims=True), axis=0)        # (ct, 1)
        sq = sq + jnp.sum(jnp.sum(xc * xc, axis=-1, keepdims=True), axis=0)  # (ct, 1)

    mean = s * inv_m                                            # (ct, 1)
    # Biased variance (PyTorch training-mode BN).  The clamp guards tiny
    # negative rounding from the E[x^2] - E[x]^2 form.
    var = jnp.maximum(sq * inv_m - mean * mean, 0.0)            # (ct, 1)
    inv_std = lax.rsqrt(var + EPS)                              # (ct, 1)

    # Fold affine into per-channel scale/shift: one multiply-add per element.
    scale = inv_std * gamma_ref[...]                            # (ct, 1)
    shift = beta_ref[...] - mean * scale                        # (ct, 1)

    # ---- Normalize pass -----------------------------------------------------
    if o_ref.dtype == jnp.bfloat16:
        # Keep the streaming pass in bf16 (packed VALU / half the store bytes
        # on v6e/v7x); stats above were still accumulated in f32.
        o_ref[...] = (x_ref[...] * scale.astype(jnp.bfloat16)
                      + shift.astype(jnp.bfloat16)).astype(o_ref.dtype)
    else:
        x = x_ref[...].astype(jnp.float32)
        o_ref[...] = (x * scale + shift).astype(o_ref.dtype)


def _pick_c_tile(n, c, hw):
    """Channel tile: multiple of 8, divides C, double-buffered in+out f32
    blocks within a conservative VMEM budget (v7x-safe), and >=4 grid tiles
    when possible (pipelining + v7x dual-core)."""
    budget = 24 << 20  # bytes; well under v7x's 32 MiB default scoped VMEM
    cands = [
        ct for ct in range(8, c + 1, 8)
        if c % ct == 0 and 4 * n * ct * hw * 4 <= budget
    ]
    if not cands:
        # Either C is not a multiple of 8 (full-dim blocks bypass the (8,128)
        # rule) or even an 8-channel block blows the budget.
        # TODO(synk): for huge N*HW, split into a two-phase stats+normalize
        # grid ("arbitrary" reduction axis + accumulator) instead.
        return c if c % 8 != 0 else 8
    pipelined = [ct for ct in cands if c // ct >= 4]
    return max(pipelined) if pipelined else max(cands)


def batchnorm2d_pallas(x_nchw, gamma, beta):
    """BatchNorm2d forward with training-mode (batch) statistics.

    x_nchw: [N, C, H, W]; gamma, beta: [C].
    """
    n, c, h, w = x_nchw.shape
    hw = h * w

    # Free views — no transpose, no extra HBM traffic.
    x3d = x_nchw.reshape(n, c, hw)
    gamma2d = gamma.reshape(c, 1).astype(jnp.float32)
    beta2d = beta.reshape(c, 1).astype(jnp.float32)

    c_tile = _pick_c_tile(n, c, hw)
    grid = (c // c_tile,)

    itemsize = jnp.dtype(x_nchw.dtype).itemsize
    cost = pl.CostEstimate(
        flops=5 * n * c * hw,                       # sum, sumsq, fma normalize
        transcendentals=c,                          # rsqrt per channel
        bytes_accessed=2 * n * c * hw * itemsize + 2 * c * 4,
    )

    # NOTE: HW = H*W is not a multiple of 128 (e.g. 784), so the last vreg of
    # every row is masked; not worth an HBM pad/transpose at these sizes.
    out3d = pl.pallas_call(
        _bn2d_kernel,
        out_shape=jax.ShapeDtypeStruct((n, c, hw), x_nchw.dtype),
        grid=grid,
        in_specs=[
            pl.BlockSpec((n, c_tile, hw), lambda i: (0, i, 0)),
            pl.BlockSpec((c_tile, 1), lambda i: (i, 0)),
            pl.BlockSpec((c_tile, 1), lambda i: (i, 0)),
        ],
        out_specs=pl.BlockSpec((n, c_tile, hw), lambda i: (0, i, 0)),
        compiler_params=pltpu.CompilerParams(
            dimension_semantics=("parallel",),      # channel tiles independent
        ),
        cost_estimate=cost,
    )(x3d, gamma2d, beta2d)

    # (N, C, HW) -> NCHW (free view).
    return out3d.reshape(n, c, h, w)


if __name__ == "__main__":
    key = jax.random.PRNGKey(0)
    kx, kg, kb = jax.random.split(key, 3)

    # Shapes from the module: BatchNorm2d(128) applied to [1, 128, 28, 28].
    N, C, H, W = 1, 128, 28, 28
    x = jax.random.normal(kx, (N, C, H, W), dtype=jnp.float32)

    # PyTorch defaults are gamma=1, beta=0; perturb to exercise the affine path.
    gamma = 1.0 + 0.1 * jax.random.normal(kg, (C,), dtype=jnp.float32)
    beta = 0.1 * jax.random.normal(kb, (C,), dtype=jnp.float32)

    out = batchnorm2d_pallas(x, gamma, beta)
    out = jax.block_until_ready(out)

    # Reference check in plain JAX (training-mode BN semantics).
    mean = jnp.mean(x, axis=(0, 2, 3), keepdims=True)
    var = jnp.mean((x - mean) ** 2, axis=(0, 2, 3), keepdims=True)
    ref = (x - mean) / jnp.sqrt(var + EPS) * gamma[None, :, None, None] \
        + beta[None, :, None, None]
    assert out.shape == (N, C, H, W)
    assert jnp.max(jnp.abs(out - ref)) < 1e-4

    # TODO(synk): running_mean/running_var momentum update (stateful buffers)
    # is not modeled; it does not affect the training-mode forward output.

    print("KERNEL_OK")
</pallas_src>

<mosaic_0001>
module attributes {stable_mosaic.version = 11 : i64} {
  func.func @_bn2d_kernel(%arg0: i32, %arg1: memref<1x32x784xf32, #tpu.memory_space<vmem>>, %arg2: memref<32x1xf32, #tpu.memory_space<vmem>>, %arg3: memref<32x1xf32, #tpu.memory_space<vmem>>, %arg4: memref<1x32x784xf32, #tpu.memory_space<vmem>>) attributes {dimension_semantics = [#tpu.dimension_semantics<parallel>], iteration_bounds = array<i64: 4>, scalar_prefetch = 0 : i64, scratch_operands = 0 : i64, tpu.core_type = #tpu.core_type<tc>, window_params = [{transform_indices = @transform_0, window_bounds = array<i64: 1, 32, 784>}, {transform_indices = @transform_1, window_bounds = array<i64: 32, 1>}, {transform_indices = @transform_2, window_bounds = array<i64: 32, 1>}, {transform_indices = @transform_3, window_bounds = array<i64: 1, 32, 784>}]} {
    %cst = arith.constant 0.000000e+00 : f32
    %0 = vector.broadcast %cst : f32 to vector<32x1xf32>
    %cst_0 = arith.constant 0.000000e+00 : f32
    %1 = vector.broadcast %cst_0 : f32 to vector<32x1xf32>
    %c0 = arith.constant 0 : index
    %c0_1 = arith.constant 0 : index
    %c0_2 = arith.constant 0 : index
    %2 = vector.load %arg1[%c0, %c0_1, %c0_2] : memref<1x32x784xf32, #tpu.memory_space<vmem>>, vector<1x32x512xf32>
    %cst_3 = arith.constant dense<0.000000e+00> : vector<1x32xf32>
    %3 = vector.multi_reduction <add>, %2, %cst_3 [2] : vector<1x32x512xf32> to vector<1x32xf32>
    %4 = vector.shape_cast %3 : vector<1x32xf32> to vector<1x32x1xf32>
    %cst_4 = arith.constant dense<0.000000e+00> : vector<32x1xf32>
    %5 = vector.multi_reduction <add>, %4, %cst_4 [0] : vector<1x32x1xf32> to vector<32x1xf32>
    %6 = arith.addf %0, %5 : vector<32x1xf32>
    %7 = arith.mulf %2, %2 : vector<1x32x512xf32>
    %cst_5 = arith.constant dense<0.000000e+00> : vector<1x32xf32>
    %8 = vector.multi_reduction <add>, %7, %cst_5 [2] : vector<1x32x512xf32> to vector<1x32xf32>
    %9 = vector.shape_cast %8 : vector<1x32xf32> to vector<1x32x1xf32>
    %cst_6 = arith.constant dense<0.000000e+00> : vector<32x1xf32>
    %10 = vector.multi_reduction <add>, %9, %cst_6 [0] : vector<1x32x1xf32> to vector<32x1xf32>
    %11 = arith.addf %1, %10 : vector<32x1xf32>
    %c0_7 = arith.constant 0 : index
    %c0_8 = arith.constant 0 : index
    %c512 = arith.constant 512 : index
    %12 = vector.load %arg1[%c0_7, %c0_8, %c512] : memref<1x32x784xf32, #tpu.memory_space<vmem>>, vector<1x32x272xf32>
    %cst_9 = arith.constant dense<0.000000e+00> : vector<1x32xf32>
    %13 = vector.multi_reduction <add>, %12, %cst_9 [2] : vector<1x32x272xf32> to vector<1x32xf32>
    %14 = vector.shape_cast %13 : vector<1x32xf32> to vector<1x32x1xf32>
    %cst_10 = arith.constant dense<0.000000e+00> : vector<32x1xf32>
    %15 = vector.multi_reduction <add>, %14, %cst_10 [0] : vector<1x32x1xf32> to vector<32x1xf32>
    %16 = arith.addf %6, %15 : vector<32x1xf32>
    %17 = arith.mulf %12, %12 : vector<1x32x272xf32>
    %cst_11 = arith.constant dense<0.000000e+00> : vector<1x32xf32>
    %18 = vector.multi_reduction <add>, %17, %cst_11 [2] : vector<1x32x272xf32> to vector<1x32xf32>
    %19 = vector.shape_cast %18 : vector<1x32xf32> to vector<1x32x1xf32>
    %cst_12 = arith.constant dense<0.000000e+00> : vector<32x1xf32>
    %20 = vector.multi_reduction <add>, %19, %cst_12 [0] : vector<1x32x1xf32> to vector<32x1xf32>
    %21 = arith.addf %11, %20 : vector<32x1xf32>
    %cst_13 = arith.constant 0.00127551018 : f32
    %22 = vector.broadcast %cst_13 : f32 to vector<32x1xf32>
    %23 = arith.mulf %16, %22 : vector<32x1xf32>
    %cst_14 = arith.constant 0.00127551018 : f32
    %24 = vector.broadcast %cst_14 : f32 to vector<32x1xf32>
    %25 = arith.mulf %21, %24 : vector<32x1xf32>
    %26 = arith.mulf %23, %23 : vector<32x1xf32>
    %27 = arith.subf %25, %26 : vector<32x1xf32>
    %cst_15 = arith.constant 0.000000e+00 : f32
    %28 = vector.broadcast %cst_15 : f32 to vector<32x1xf32>
    %29 = arith.maximumf %27, %28 : vector<32x1xf32>
    %cst_16 = arith.constant 9.99999974E-6 : f32
    %30 = vector.broadcast %cst_16 : f32 to vector<32x1xf32>
    %31 = arith.addf %29, %30 : vector<32x1xf32>
    %32 = math.rsqrt %31 : vector<32x1xf32>
    %c0_17 = arith.constant 0 : index
    %c0_18 = arith.constant 0 : index
    %33 = vector.load %arg2[%c0_17, %c0_18] : memref<32x1xf32, #tpu.memory_space<vmem>>, vector<32x1xf32>
    %34 = arith.mulf %32, %33 : vector<32x1xf32>
    %c0_19 = arith.constant 0 : index
    %c0_20 = arith.constant 0 : index
    %35 = vector.load %arg3[%c0_19, %c0_20] : memref<32x1xf32, #tpu.memory_space<vmem>>, vector<32x1xf32>
    %36 = arith.mulf %23, %34 : vector<32x1xf32>
    %37 = arith.subf %35, %36 : vector<32x1xf32>
    %c0_21 = arith.constant 0 : index
    %c0_22 = arith.constant 0 : index
    %c0_23 = arith.constant 0 : index
    %38 = vector.load %arg1[%c0_21, %c0_22, %c0_23] : memref<1x32x784xf32, #tpu.memory_space<vmem>>, vector<1x32x784xf32>
    %39 = vector.shape_cast %34 : vector<32x1xf32> to vector<1x32x1xf32>
    %40 = vector.broadcast %39 : vector<1x32x1xf32> to vector<1x32x784xf32>
    %41 = arith.mulf %38, %40 : vector<1x32x784xf32>
    %42 = vector.shape_cast %37 : vector<32x1xf32> to vector<1x32x1xf32>
    %43 = vector.broadcast %42 : vector<1x32x1xf32> to vector<1x32x784xf32>
    %44 = arith.addf %41, %43 : vector<1x32x784xf32>
    %c0_24 = arith.constant 0 : index
    %c0_25 = arith.constant 0 : index
    %c0_26 = arith.constant 0 : index
    %45 = vector.load %arg4[%c0_24, %c0_25, %c0_26] : memref<1x32x784xf32, #tpu.memory_space<vmem>>, vector<1x32x784xf32>
    tpu.vector_store %arg4[%c0_24, %c0_25, %c0_26], %44 {strides = array<i32>} : memref<1x32x784xf32, #tpu.memory_space<vmem>>, vector<1x32x784xf32>,
    return
  }
  func.func @transform_0(%arg0: i32) -> (i32, i32, i32) {
    %c0_i32 = arith.constant 0 : i32
    %c0_i32_0 = arith.constant 0 : i32
    %c0_i32_1 = arith.constant 0 : i32
    return %c0_i32, %arg0, %c0_i32_0 : i32, i32, i32
  }
  func.func @transform_1(%arg0: i32) -> (i32, i32) {
    %c0_i32 = arith.constant 0 : i32
    %c0_i32_0 = arith.constant 0 : i32
    return %arg0, %c0_i32 : i32, i32
  }
  func.func @transform_2(%arg0: i32) -> (i32, i32) {
    %c0_i32 = arith.constant 0 : i32
    %c0_i32_0 = arith.constant 0 : i32
    return %arg0, %c0_i32 : i32, i32
  }
  func.func @transform_3(%arg0: i32) -> (i32, i32, i32) {
    %c0_i32 = arith.constant 0 : i32
    %c0_i32_0 = arith.constant 0 : i32
    %c0_i32_1 = arith.constant 0 : i32
    return %c0_i32, %arg0, %c0_i32_0 : i32, i32, i32
  }
}

</mosaic_0001>

<bundles_post_ra>
// kernel: tpu_custom_call.1
= control target key start
LH: loop header
LB: loop body
LE: loop exit
PB: predicated region body
PF: predicated region fallthrough
CT: control target
= control target key end

     0   :  { %s710_s12 = smov 0   ;;  %s990_s0 = inlined_call_operand.vmem [shape: f32[1,128,784], index: 0, kind: input, shape index: {}]   ;;  %s991_s1 = inlined_call_operand.vmem [shape: f32[128,1], index: 1, kind: input, shape index: {}]   ;;  %s992_s2 = inlined_call_operand.vmem [shape: f32[128,1], index: 2, kind: input, shape index: {}]   ;;  %s993_s3 = inlined_call_operand.vmem [shape: f32[1,128,784], index: 3, kind: output, shape index: {}]  }
   0x1 LB: > { %s646_s13 = sadd.s32 4294967295, %s687_s12   ;;  %p650_p0 = scmp.ge.s32.totalorder %s687_s12, 1  ;;  %s687_s12 = sphi %s710_s12, %s13_s12  }
   0x2   : > { %p161_p1 = scmp.lt.s32.totalorder %s687_s12, 5 }
   0x4   : > { %p162_p2 = pnand %p650_p0, %p161_p1 }
   0x5   : > { %s651_s14 = sshll.u32 (!%p162_p2), %s646_s13, 2  ;;  %vm324_vm0 = vcmask (!%p162_p2), 130048  }
   0x6   : > { %165 = sbr.rel (%p162_p2) target bundleno = 370 (0x172), region = 32  ;;  %p198_p3 = scmp.lt.s32.totalorder (!%p162_p2), %s651_s14, 15 }
   0xd   : > { %s995_s14 = smov (!%p198_p3, %s651_s14), 15 }
   0xe   : > { %s661_s15 = smul.u32 56, %s995_s14  ;;  %s654_s19 = sshll.u32 %s995_s14, 3 }
   0xf   : > { %s208_s22 = scalar_lea.vmem %s991_s1, %s654_s19  ;;  %s214_s25 = scalar_lea.vmem %s992_s2, %s654_s19 }
  0x10   : > { %s726_s18 = scalar_lea.vmem %s990_s0, %s661_s15  ;;  %s922_s28 = scalar_lea.vmem %s993_s3, %s661_s15 }
  0x11   : > { %v729_v0 = vld [vmem:[%s726_s18 + $0x58] sm:$0xff]  ;;  %v732_v1 = vld [vmem:[%s726_s18 + $0x60] sm:$0xff]  ;;  %v735_v2 = vld [vmem:[%s726_s18 + $0x68] sm:$0xff] }
  0x12   : > { %v329_v3 = vadd.f32 %v732_v1, %v729_v0  ;;  %v330_v4 = vsel %vm324_vm0, %v735_v2, 0.0  ;;  %v742_v5 = vld [vmem:[%s726_s18 + $0x20] sm:$0xff]  ;;  %v745_v6 = vld [vmem:[%s726_s18 + $0x28] sm:$0xff]  ;;  %v748_v7 = vld [vmem:[%s726_s18 + $0x30] sm:$0xff] }
  0x13   : > { %v323_v8 = vadd.f32 %v745_v6, %v742_v5  ;;  %v325_v9 = vsel %vm324_vm0, %v748_v7, 0.0  ;;  %v755_v10 = vld [vmem:[%s726_s18 + $0xc8] sm:$0xff]  ;;  %v758_v11 = vld [vmem:[%s726_s18 + $0xd0] sm:$0xff]  ;;  %v761_v12 = vld [vmem:[%s726_s18 + $0xd8] sm:$0xff] }
  0x14   : > { %v331_v13 = vadd.f32 %v330_v4, %v329_v3  ;;  %v339_v14 = vadd.f32 %v758_v11, %v755_v10  ;;  %v340_v15 = vsel %vm324_vm0, %v761_v12, 0.0  ;;  %v768_v16 = vld [vmem:[%s726_s18 + $0x90] sm:$0xff]  ;;  %v771_v17 = vld [vmem:[%s726_s18 + $0x98] sm:$0xff]  ;;  %v774_v18 = vld [vmem:[%s726_s18 + $0xa0] sm:$0xff] }
  0x15   : > { %v326_v19 = vadd.f32 %v325_v9, %v323_v8  ;;  %v334_v20 = vadd.f32 %v771_v17, %v768_v16  ;;  %v335_v21 = vsel %vm324_vm0, %v774_v18, 0.0  ;;  %v781_v22 = vld [vmem:[%s726_s18 + $0x70] sm:$0xff]  ;;  %v784_v23 = vld [vmem:[%s726_s18 + $0x78] sm:$0xff]  ;;  %v787_v24 = vld [vmem:[%s726_s18 + $0x80] sm:$0xff] }
  0x16   : > { %332 = vadd.xlane.f32.xlu1 %v331_v13  ;;  %v341_v25 = vadd.f32 %v340_v15, %v339_v14  ;;  %v249_v26 = vadd.f32 %v784_v23, %v781_v22  ;;  %v792_v27 = vld [vmem:[%s726_s18] sm:$0xff]  ;;  %v795_v28 = vld [vmem:[%s726_s18 + $0x8] sm:$0xff]  ;;  %v801_v31 = vld [vmem:[%s726_s18 + $0x10] sm:$0xff]  ;;  %v275_v41 = vmul.f32 %v781_v22, %v781_v22  ;;  %v276_v42 = vmul.f32 %v784_v23, %v784_v23 }
  0x17   : > { %327 = vadd.xlane.f32.xlu0 %v326_v19  ;;  %v336_v29 = vadd.f32 %v335_v21, %v334_v20  ;;  %v798_v30 = vld [vmem:[%s726_s18 + $0x88] sm:$0xff]  ;;  %v239_v32 = vadd.f32 %v795_v28, %v792_v27  ;;  %v267_v34 = vmul.f32 %v792_v27, %v792_v27  ;;  %v268_v35 = vmul.f32 %v795_v28, %v795_v28  ;;  %v814_v37 = vld [vmem:[%s726_s18 + $0x18] sm:$0xff]  ;;  %v817_v38 = vld [vmem:[%s726_s18 + $0xb0] sm:$0xff] }
  0x18   : > { %v806_v33 = vld [vmem:[%s726_s18 + $0xa8] sm:$0xff]  ;;  %v250_v36 = vadd.f32 %v249_v26, %v787_v24  ;;  %v820_v39 = vld [vmem:[%s726_s18 + $0xb8] sm:$0xff]  ;;  %v269_v40 = vmul.f32 %v801_v31, %v801_v31  ;;  %v835_v46 = vld [vmem:[%s726_s18 + $0x40] sm:$0xff]  ;;  %v280_v49 = vmul.f32 %v817_v38, %v817_v38  ;;  %v270_v63 = vmul.f32 %v814_v37, %v814_v37 }
  0x19   : > { %v240_v43 = vadd.f32 %v239_v32, %v801_v31  ;;  %v254_v44 = vadd.f32 %v817_v38, %v806_v33  ;;  %v832_v45 = vld [vmem:[%s726_s18 + $0x38] sm:$0xff]  ;;  %v838_v47 = vld [vmem:[%s726_s18 + $0x48] sm:$0xff]  ;;  %v279_v48 = vmul.f32 %v806_v33, %v806_v33  ;;  %v272_v53 = vmul.f32 %v835_v46, %v835_v46  ;;  %v853_v55 = vld [vmem:[%s726_s18 + $0xc0] sm:$0xff] }
  0x1a   : > { %342 = vadd.xlane.f32.xlu1 %v341_v25  ;;  %v251_v50 = vadd.f32 %v250_v36, %v798_v30  ;;  %v244_v51 = vadd.f32 %v835_v46, %v832_v45  ;;  %v271_v52 = vmul.f32 %v832_v45, %v832_v45  ;;  %v273_v57 = vmul.f32 %v838_v47, %v838_v47  ;;  %v859_v59 = vld [vmem:[%s726_s18 + $0x50] sm:$0xff] }
  0x1b   : > { %337 = vadd.xlane.f32.xlu0 %v336_v29  ;;  %v241_v54 = vadd.f32 %v240_v43, %v814_v37  ;;  %v255_v56 = vadd.f32 %v254_v44, %v820_v39  ;;  %v283_v58 = vadd.f32 %v268_v35, %v267_v34  ;;  %v274_v62 = vmul.f32 %v859_v59, %v859_v59 }
  0x1c   : > { %v245_v60 = vadd.f32 %v244_v51, %v838_v47  ;;  %v288_v61 = vadd.f32 %v272_v53, %v271_v52  ;;  %v281_v8 = vmul.f32 %v820_v39, %v820_v39  ;;  %v298_v9 = vadd.f32 %v280_v49, %v279_v48 }
  0x1d   : > { %v256_v3 = vadd.f32 %v255_v56, %v853_v55  ;;  %v284_v14 = vadd.f32 %v283_v58, %v269_v40  ;;  %v277_v15 = vmul.f32 %v787_v24, %v787_v24  ;;  %v293_v19 = vadd.f32 %v276_v42, %v275_v41 }
  0x1e   : > { %252 = vadd.xlane.f32.xlu1 %v251_v50  ;;  %v289_v4 = vadd.f32 %v288_v61, %v273_v57  ;;  %v246_v13 = vadd.f32 %v245_v60, %v859_v59  ;;  %v355_v20 = vmul.f32 %v729_v0, %v729_v0  ;;  %v356_v21 = vmul.f32 %v732_v1, %v732_v1 }
  0x1f   : > { %242 = vadd.xlane.f32.xlu0 %v241_v54  ;;  %v357_v25 = vmul.f32 %v735_v2, %v735_v2  ;;  %v352_v26 = vmul.f32 %v742_v5, %v742_v5  ;;  %v282_v32 = vmul.f32 %v853_v55, %v853_v55  ;;  %v299_v34 = vadd.f32 %v298_v9, %v281_v8 }
  0x20   : > { %v290_v29 = vadd.f32 %v289_v4, %v274_v62  ;;  %v353_v35 = vmul.f32 %v745_v6, %v745_v6  ;;  %v285_v36 = vadd.f32 %v284_v14, %v270_v63  ;;  %v278_v40 = vmul.f32 %v798_v30, %v798_v30 }
  0x21   : > { %v294_v41 = vadd.f32 %v293_v19, %v277_v15  ;;  %v354_v42 = vmul.f32 %v748_v7, %v748_v7  ;;  %v369_v43 = vadd.f32 %v356_v21, %v355_v20  ;;  %v370_v44 = vsel %vm324_vm0, %v357_v25, 0.0 }
  0x22   : > { %257 = vadd.xlane.f32.xlu1 %v256_v3  ;;  %v300_v48 = vadd.f32 %v299_v34, %v282_v32  ;;  %v364_v49 = vadd.f32 %v353_v35, %v352_v26  ;;  %v361_v50 = vmul.f32 %v755_v10, %v755_v10  ;;  %v362_v51 = vmul.f32 %v758_v11, %v758_v11 }
  0x23   : > { %247 = vadd.xlane.f32.xlu0 %v246_v13  ;;  %v295_v52 = vadd.f32 %v294_v41, %v278_v40  ;;  %v363_v53 = vmul.f32 %v761_v12, %v761_v12  ;;  %v358_v54 = vmul.f32 %v768_v16, %v768_v16  ;;  %v359_v56 = vmul.f32 %v771_v17, %v771_v17 }
  0x24   : > { %v365_v57 = vsel %vm324_vm0, %v354_v42, 0.0  ;;  %v360_v58 = vmul.f32 %v774_v18, %v774_v18  ;;  %v371_v60 = vadd.f32 %v370_v44, %v369_v43  ;;  %v379_v61 = vadd.f32 %v362_v51, %v361_v50 }
  0x25   : > { %v366_v62 = vadd.f32 %v365_v57, %v364_v49  ;;  %v380_v63 = vsel %vm324_vm0, %v363_v53, 0.0  ;;  %v374_v3 = vadd.f32 %v359_v56, %v358_v54  ;;  %v689_v13 = vmov 0  }
  0x26   : > { %291 = vadd.xlane.f32.xlu1 %v290_v29  ;;  %v375_v4 = vsel %vm324_vm0, %v360_v58, 0.0  ;;  %v381_v8 = vadd.f32 %v380_v63, %v379_v61  ;;  %671 = vset.pattern.permute.xlu0 %v689_v13 }
  0x27   : > { %286 = vadd.xlane.f32.xlu0 %v285_v36  ;;  %v376_v9 = vadd.f32 %v375_v4, %v374_v3  ;;  %672 = vset.pattern.permute.xlu1 %v689_v13 }
  0x2a   : > { %301 = vadd.xlane.f32.xlu1 %v300_v48 }
  0x2b   : > { %296 = vadd.xlane.f32.xlu0 %v295_v52 }
  0x2e   : > { %372 = vadd.xlane.f32.xlu1 %v371_v60 }
  0x2f   : > { %367 = vadd.xlane.f32.xlu0 %v366_v62 }
  0x32   : > { %382 = vadd.xlane.f32.xlu1 %v381_v8 }
  0x33   : > { %377 = vadd.xlane.f32.xlu0 %v376_v9 }
  0xa3   : > { %v333_v14 = vpop.xlane.xlu1 %332 }
  0xa4   : > { %v328_v15 = vpop.xlane.xlu0 %327 }
  0xa7   : > { %v343_v19 = vpop.xlane.xlu1 %342 }
  0xa8   : > { %v338_v20 = vpop.xlane.xlu0 %337 }
  0xab   : > { %v253_v21 = vpop.xlane.xlu1 %252 }
  0xac   : > { %v243_v25 = vpop.xlane.xlu0 %242  ;;  %v350_v44 = vadd.f32 %v338_v20, %v253_v21 }
  0xad   : > { %v348_v36 = vadd.f32 %v328_v15, %v243_v25 }
  0xae   : > { %v394_v57 = vmul.f32 0.0012755102, %v350_v44 }
  0xaf   : > { %v258_v26 = vpop.xlane.xlu1 %257  ;;  %v392_v48 = vmul.f32 0.0012755102, %v348_v36 }
  0xb0   : > { %v248_v29 = vpop.xlane.xlu0 %247  ;;  %v351_v42 = vadd.f32 %v343_v19, %v258_v26  ;;  %v402_v15 = vmul.f32 %v394_v57, %v394_v57 }
  0xb1   : > { %v349_v35 = vadd.f32 %v333_v14, %v248_v29  ;;  %v400_v58 = vmul.f32 %v392_v48, %v392_v48 }
  0xb2   : > { %v395_v53 = vmul.f32 0.0012755102, %v351_v42 }
  0xb3   : > { %v292_v32 = vpop.xlane.xlu1 %291  ;;  %v393_v43 = vmul.f32 0.0012755102, %v349_v35 }
  0xb4   : > { %v287_v34 = vpop.xlane.xlu0 %286  ;;  %v403_v9 = vmul.f32 %v395_v53, %v395_v53 }
  0xb5   : > { %v401_v54 = vmul.f32 %v393_v43, %v393_v43 }
  0xb7   : > { %v302_v40 = vpop.xlane.xlu1 %301 }
  0xb8   : > { %v297_v41 = vpop.xlane.xlu0 %296 }
  0xbb   : > { %v373_v49 = vpop.xlane.xlu1 %372 }
  0xbc   : > { %v389_v50 = vadd.f32 %v373_v49, %v292_v32  ;;  %v368_v51 = vpop.xlane.xlu0 %367 }
  0xbd   : > { %v388_v52 = vadd.f32 %v368_v51, %v287_v34  ;;  %v422_v51 = vld [vmem:[%s208_s22 + $0x10] sm:$0xff] }
  0xbe   : > { %v397_v56 = vmul.f32 0.0012755102, %v389_v50 }
  0xbf   : > { %v396_v60 = vmul.f32 0.0012755102, %v388_v52  ;;  %v383_v61 = vpop.xlane.xlu1 %382 }
  0xc0   : > { %v405_v62 = vsub.f32 %v397_v56, %v401_v54  ;;  %v391_v63 = vadd.f32 %v383_v61, %v302_v40  ;;  %v378_v3 = vpop.xlane.xlu0 %377  ;;  %v421_v40 = vld [vmem:[%s208_s22 + $0x8] sm:$0xff] }
  0xc1   : > { %v404_v4 = vsub.f32 %v396_v60, %v400_v58  ;;  %v390_v8 = vadd.f32 %v378_v3, %v297_v41  ;;  %v420_v41 = vld [vmem:[%s208_s22] sm:$0xff]  ;;  %v423_v58 = vld [vmem:[%s208_s22 + $0x18] sm:$0xff] }
  0xc2   : > { %v409_v13 = vmax.f32 %v405_v62, 0.0  ;;  %v399_v14 = vmul.f32 0.0012755102, %v391_v63  ;;  %v428_v62 = vld [vmem:[%s214_s25] sm:$0xff] }
  0xc3   : > { %v408_v19 = vmax.f32 %v404_v4, 0.0  ;;  %v398_v20 = vmul.f32 0.0012755102, %v390_v8  ;;  %v429_v4 = vld [vmem:[%s214_s25 + $0x8] sm:$0xff] }
  0xc4   : > { %v413_v21 = vadd.f32 1e-05, %v409_v13  ;;  %v407_v25 = vsub.f32 %v399_v14, %v403_v9  ;;  %v430_v13 = vld [vmem:[%s214_s25 + $0x10] sm:$0xff] }
  0xc5   : > { %v412_v26 = vadd.f32 1e-05, %v408_v19  ;;  %v406_v29 = vsub.f32 %v398_v20, %v402_v15  ;;  %v431_v19 = vld [vmem:[%s214_s25 + $0x18] sm:$0xff] }
  0xc6   : > { %673 = vrsqrt.f32 %v413_v21  ;;  %v411_v32 = vmax.f32 %v407_v25, 0.0 }
  0xc7   : > { %675 = vrsqrt.f32 %v412_v26  ;;  %v410_v34 = vmax.f32 %v406_v29, 0.0 }
  0xc8   : > { %v415_v35 = vadd.f32 1e-05, %v411_v32 }
  0xc9   : > { %v414_v36 = vadd.f32 1e-05, %v410_v34 }
  0xcb   : > { %677 = vrsqrt.f32 %v414_v36 }
  0xcc   : > { %679 = vrsqrt.f32 %v415_v35 }
  0xd0   : > { %v674_v42 = vpop.eup %673 }
  0xd1   : > { %v676_v44 = vpop.eup %675  ;;  %v425_v49 = vmul.f32 %v674_v42, %v421_v40 }
  0xd2   : > { %v424_v50 = vmul.f32 %v676_v44, %v420_v41 }
  0xd3   : > { %447 = vperm.xlu1 %672, %v425_v49   ;;  %v433_v3 = vmul.f32 %v425_v49, %v393_v43 }
  0xd4   : > { %442 = vperm.xlu0 %671, %v424_v50   ;;  %v432_v61 = vmul.f32 %v424_v50, %v392_v48 }
  0xd5   : > { %v678_v52 = vpop.eup %677  ;;  %v437_v8 = vsub.f32 %v429_v4, %v433_v3 }
  0xd6   : > { %v426_v54 = vmul.f32 %v678_v52, %v422_v51  ;;  %v680_v56 = vpop.eup %679  ;;  %v436_v63 = vsub.f32 %v428_v62, %v432_v61 }
  0xd7   : > { %v427_v60 = vmul.f32 %v680_v56, %v423_v58 }
  0xd8   : > { %452 = vperm.xlu1 %672, %v426_v54   ;;  %v434_v9 = vmul.f32 %v426_v54, %v394_v57 }
  0xd9   : > { %v435_v15 = vmul.f32 %v427_v60, %v395_v53 }
  0xda   : > { %v438_v14 = vsub.f32 %v430_v13, %v434_v9 }
  0xdb   : > { %v439_v20 = vsub.f32 %v431_v19, %v435_v15 }
  0xdc   : > { %457 = vperm.xlu1 %672, %v427_v60  }
  0xe0   : > { %490 = vperm.xlu1 %672, %v436_v63  }
  0xe4   : > { %495 = vperm.xlu1 %672, %v437_v8  }
  0xe8   : > { %500 = vperm.xlu1 %672, %v438_v14  }
  0xec   : > { %505 = vperm.xlu1 %672, %v439_v20  }
 0x152   : > { %v448_v21 = vpop.permute.xlu1 %447 }
 0x153   : > { %v443_v48 = vpop.permute.xlu0 %442  ;;  %v468_v44 = vmul.f32 %v448_v21, %v835_v46  ;;  %v471_v49 = vmul.f32 %v448_v21, %v729_v0  ;;  %v472_v50 = vmul.f32 %v448_v21, %v732_v1  ;;  %v473_v51 = vmul.f32 %v448_v21, %v735_v2 }
 0x154   : > { %v460_v43 = vmul.f32 %v443_v48, %v792_v27  ;;  %v461_v29 = vmul.f32 %v443_v48, %v795_v28  ;;  %v462_v57 = vmul.f32 %v443_v48, %v801_v31  ;;  %v463_v32 = vmul.f32 %v443_v48, %v814_v37 }
 0x155   : > { %v464_v53 = vmul.f32 %v443_v48, %v742_v5  ;;  %v465_v34 = vmul.f32 %v443_v48, %v745_v6  ;;  %v466_v27 = vmul.f32 %v443_v48, %v748_v7  ;;  %v467_v5 = vmul.f32 %v448_v21, %v832_v45 }
 0x156   : > { %v469_v6 = vmul.f32 %v448_v21, %v838_v47  ;;  %v470_v7 = vmul.f32 %v448_v21, %v859_v59 }
 0x157   : > { %v453_v25 = vpop.permute.xlu1 %452 }
 0x158   : > { %v474_v2 = vmul.f32 %v453_v25, %v781_v22  ;;  %v475_v56 = vmul.f32 %v453_v25, %v784_v23  ;;  %v476_v58 = vmul.f32 %v453_v25, %v787_v24  ;;  %v477_v60 = vmul.f32 %v453_v25, %v798_v30 }
 0x159   : > { %v478_v61 = vmul.f32 %v453_v25, %v768_v16  ;;  %v479_v62 = vmul.f32 %v453_v25, %v771_v17  ;;  %v480_v22 = vmul.f32 %v453_v25, %v774_v18 }
 0x15b   : > { %v911_v26 = vpop.permute.xlu1 %457 }
 0x15c   : > { %v481_v17 = vmul.f32 %v911_v26, %v806_v33  ;;  %v482_v18 = vmul.f32 %v911_v26, %v817_v38  ;;  %v483_v9 = vmul.f32 %v911_v26, %v820_v39  ;;  %v484_v13 = vmul.f32 %v911_v26, %v853_v55 }
 0x15d   : > { %v485_v33 = vmul.f32 %v911_v26, %v755_v10  ;;  %v486_v38 = vmul.f32 %v911_v26, %v758_v11  ;;  %v487_v39 = vmul.f32 %v911_v26, %v761_v12 }
 0x15f   : > { %v491_v28 = vpop.permute.xlu1 %490 }
 0x160   : > { %v508_v31 = vadd.f32 %v491_v28, %v460_v43  ;;  %v509_v35 = vadd.f32 %v491_v28, %v461_v29  ;;  %v510_v37 = vadd.f32 %v491_v28, %v462_v57  ;;  %v511_v36 = vadd.f32 %v491_v28, %v463_v32 }
 0x161   : > { %v512_v40 = vadd.f32 %v491_v28, %v464_v53  ;;  %v513_v41 = vadd.f32 %v491_v28, %v465_v34  ;;  %v514_v42 = vadd.f32 %v491_v28, %v466_v27 }
 0x162   : > { %536 = vst [vmem:[%s922_s28] sm:$0xff] %v508_v31  ;;  %537 = vst [vmem:[%s922_s28 + $0x8] sm:$0xff] %v509_v35 }
 0x163   : > { %538 = vst [vmem:[%s922_s28 + $0x10] sm:$0xff] %v510_v37  ;;  %539 = vst [vmem:[%s922_s28 + $0x18] sm:$0xff] %v511_v36  ;;  %v496_v45 = vpop.permute.xlu1 %495 }
 0x164   : > { %540 = vst [vmem:[%s922_s28 + $0x20] sm:$0xff] %v512_v40  ;;  %541 = vst [vmem:[%s922_s28 + $0x28] sm:$0xff] %v513_v41  ;;  %v515_v46 = vadd.f32 %v496_v45, %v467_v5  ;;  %v516_v47 = vadd.f32 %v496_v45, %v468_v44  ;;  %v517_v59 = vadd.f32 %v496_v45, %v469_v6 }
 0x165   : > { %542 = vst.msk [vmem:[%s922_s28 + $0x30] sm:$0xff] %vm324_vm0, %v514_v42  ;;  %v518_v52 = vadd.f32 %v496_v45, %v470_v7  ;;  %v519_v0 = vadd.f32 %v496_v45, %v471_v49  ;;  %v520_v1 = vadd.f32 %v496_v45, %v472_v50  ;;  %v521_v54 = vadd.f32 %v496_v45, %v473_v51 }
 0x166   : > { %543 = vst [vmem:[%s922_s28 + $0x38] sm:$0xff] %v515_v46  ;;  %544 = vst [vmem:[%s922_s28 + $0x40] sm:$0xff] %v516_v47 }
 0x167   : > { %545 = vst [vmem:[%s922_s28 + $0x48] sm:$0xff] %v517_v59  ;;  %546 = vst [vmem:[%s922_s28 + $0x50] sm:$0xff] %v518_v52  ;;  %v501_v23 = vpop.permute.xlu1 %500 }
 0x168   : > { %547 = vst [vmem:[%s922_s28 + $0x58] sm:$0xff] %v519_v0  ;;  %548 = vst [vmem:[%s922_s28 + $0x60] sm:$0xff] %v520_v1  ;;  %v522_v24 = vadd.f32 %v501_v23, %v474_v2  ;;  %v523_v30 = vadd.f32 %v501_v23, %v475_v56  ;;  %v524_v63 = vadd.f32 %v501_v23, %v476_v58 }
 0x169   : > { %549 = vst.msk [vmem:[%s922_s28 + $0x68] sm:$0xff] %vm324_vm0, %v521_v54  ;;  %v525_v3 = vadd.f32 %v501_v23, %v477_v60  ;;  %v526_v4 = vadd.f32 %v501_v23, %v478_v61  ;;  %v527_v16 = vadd.f32 %v501_v23, %v479_v62  ;;  %v528_v8 = vadd.f32 %v501_v23, %v480_v22 }
 0x16a   : > { %550 = vst [vmem:[%s922_s28 + $0x70] sm:$0xff] %v522_v24  ;;  %551 = vst [vmem:[%s922_s28 + $0x78] sm:$0xff] %v523_v30 }
 0x16b   : > { %552 = vst [vmem:[%s922_s28 + $0x80] sm:$0xff] %v524_v63  ;;  %553 = vst [vmem:[%s922_s28 + $0x88] sm:$0xff] %v525_v3  ;;  %v506_v55 = vpop.permute.xlu1 %505 }
 0x16c   : > { %554 = vst [vmem:[%s922_s28 + $0x90] sm:$0xff] %v526_v4  ;;  %555 = vst [vmem:[%s922_s28 + $0x98] sm:$0xff] %v527_v16  ;;  %v529_v14 = vadd.f32 %v506_v55, %v481_v17  ;;  %v530_v15 = vadd.f32 %v506_v55, %v482_v18  ;;  %v531_v19 = vadd.f32 %v506_v55, %v483_v9 }
 0x16d   : > { %556 = vst.msk [vmem:[%s922_s28 + $0xa0] sm:$0xff] %vm324_vm0, %v528_v8  ;;  %v532_v20 = vadd.f32 %v506_v55, %v484_v13  ;;  %v533_v21 = vadd.f32 %v506_v55, %v485_v33  ;;  %v534_v25 = vadd.f32 %v506_v55, %v486_v38  ;;  %v535_v48 = vadd.f32 %v506_v55, %v487_v39 }
 0x16e   : > { %557 = vst [vmem:[%s922_s28 + $0xa8] sm:$0xff] %v529_v14  ;;  %558 = vst [vmem:[%s922_s28 + $0xb0] sm:$0xff] %v530_v15 }
 0x16f   : > { %559 = vst [vmem:[%s922_s28 + $0xb8] sm:$0xff] %v531_v19  ;;  %560 = vst [vmem:[%s922_s28 + $0xc0] sm:$0xff] %v532_v20 }
 0x170   : > { %561 = vst [vmem:[%s922_s28 + $0xc8] sm:$0xff] %v533_v21  ;;  %562 = vst [vmem:[%s922_s28 + $0xd0] sm:$0xff] %v534_v25 }
 0x171   : > { %563 = vst.msk [vmem:[%s922_s28 + $0xd8] sm:$0xff] %vm324_vm0, %v535_v48 }
 0x172 PF: > { %s13_s12 = sadd.s32 1, %s687_s12  }
 0x173   : > { %p10_p4 = scmp.ge.s32.totalorder %s13_s12, 6  }
 0x175   :  { %12 = sbr.rel (!%p10_p4) target bundleno = 1 (0x1), region = 68 }

</bundles_post_ra>
